<compile_context>
chip_gen: v6e
topology: v6e:2x2x1
jax: 0.10.0
libtpu: 0.0.40
codegen_flags: <defaults>
</compile_context>

<pallas_src>
import functools

import jax
import jax.numpy as jnp
from jax import lax
from jax.experimental import pallas as pl
from jax.experimental.pallas import tpu as pltpu


# NT contraction: contract the C8 axis of q against the C8 axis of k directly
# (Mosaic feeds the transposed operand to the MXU; no explicit k.T relayout).
_NT_DIMS = (((1,), (1,)), ((), ()))


# --------------------------------------------------------------------------- #
# Pass 1: 1x1-conv projections (q, k, v) -- computed once per pixel.
# --------------------------------------------------------------------------- #
def _project_kernel(x_ref, wq_ref, bq_ref, wk_ref, bk_ref, wv_ref, bv_ref,
                    q_ref, k_ref, v_ref):
    # One on-chip transpose of the raw (C, TP) channel-major tile, shared by
    # all three projections (amortized over the whole pre-pass).
    xt = x_ref[0].T                                               # (TP, C) bf16
    q = jnp.dot(xt, wq_ref[...], preferred_element_type=jnp.float32) + bq_ref[...]
    k = jnp.dot(xt, wk_ref[...], preferred_element_type=jnp.float32) + bk_ref[...]
    v = jnp.dot(xt, wv_ref[...], preferred_element_type=jnp.float32) + bv_ref[...]
    q_ref[0] = q.astype(q_ref.dtype)
    k_ref[0] = k.astype(k_ref.dtype)
    v_ref[0] = v.astype(v_ref.dtype)


# --------------------------------------------------------------------------- #
# Pass 2a: single-pass attention for small N (no online softmax machinery).
# --------------------------------------------------------------------------- #
def _attn_single_pass_kernel(n_valid, q_ref, k_ref, v_ref, xres_ref, gamma_ref,
                             out_ref):
    q = q_ref[0]                                                  # (TQ, C8) bf16
    k = k_ref[0]                                                  # (Np, C8) bf16
    v = v_ref[0]                                                  # (Np, C)  bf16

    s = lax.dot_general(q, k, _NT_DIMS,
                        preferred_element_type=jnp.float32)       # (TQ, Np)
    n_pad = k_ref.shape[1]
    if n_pad != n_valid:  # static: mask key columns that are pure padding
        col = lax.broadcasted_iota(jnp.int32, (1, n_pad), 1)
        s = jnp.where(col < n_valid, s, -1e30)

    m = jnp.max(s, axis=-1, keepdims=True)
    p = jnp.exp(s - m)
    l = jnp.sum(p, axis=-1, keepdims=True)
    o = jnp.dot(p.astype(jnp.bfloat16), v, preferred_element_type=jnp.float32)

    gamma = gamma_ref[0]
    inv_l = pl.reciprocal(l, approx=True)
    # residual uses the memory-reinterpreted (N, C) view of x (torch .view quirk)
    out_ref[0] = (gamma * (o * inv_l) + xres_ref[0]).astype(out_ref.dtype)


# --------------------------------------------------------------------------- #
# Pass 2b: flash-style attention (online softmax) for large N.
# --------------------------------------------------------------------------- #
def _attn_flash_kernel(n_valid, n_pad, tk, q_ref, k_ref, v_ref, xres_ref,
                       gamma_ref, out_ref, m_sc, l_sc, acc_sc):
    kv_idx = pl.program_id(2)

    @pl.when(kv_idx == 0)
    def _init():
        m_sc[...] = jnp.full(m_sc.shape, -jnp.inf, dtype=jnp.float32)
        l_sc[...] = jnp.zeros(l_sc.shape, dtype=jnp.float32)
        acc_sc[...] = jnp.zeros(acc_sc.shape, dtype=jnp.float32)

    q = q_ref[0]                      # (TQ, C8) bf16, resident across kv steps
    k = k_ref[0]                      # (TK, C8) bf16
    v = v_ref[0]                      # (TK, C)  bf16

    s = lax.dot_general(q, k, _NT_DIMS, preferred_element_type=jnp.float32)
    if n_pad != n_valid:  # static: mask padded key columns (only last tile hits)
        col = kv_idx * tk + lax.broadcasted_iota(jnp.int32, (1, tk), 1)
        s = jnp.where(col < n_valid, s, -1e30)

    m_prev = m_sc[...]
    m_new = jnp.maximum(m_prev, jnp.max(s, axis=-1, keepdims=True))
    alpha = jnp.exp(m_prev - m_new)
    p = jnp.exp(s - m_new)
    l_sc[...] = alpha * l_sc[...] + jnp.sum(p, axis=-1, keepdims=True)
    acc_sc[...] = alpha * acc_sc[...] + jnp.dot(
        p.astype(jnp.bfloat16), v, preferred_element_type=jnp.float32)
    m_sc[...] = m_new

    @pl.when(kv_idx == pl.num_programs(2) - 1)
    def _finalize():
        gamma = gamma_ref[0]
        inv_l = pl.reciprocal(l_sc[...], approx=True)
        out_ref[0] = (gamma * (acc_sc[...] * inv_l) + xres_ref[0]).astype(out_ref.dtype)


# --------------------------------------------------------------------------- #
# Wrapper
# --------------------------------------------------------------------------- #
def _round_up(x, m):
    return ((x + m - 1) // m) * m


def _pick_tile(n_pad, preferred):
    for t in preferred:
        if t <= n_pad and n_pad % t == 0:
            return t
    return 128  # n_pad is always a multiple of 128


def _vmem_limit_bytes(tq, tk, c, c8):
    # double-buffered streaming inputs + f32 residual/output + f32 score tile
    stream = 2 * (tq * c8 * 2 + tk * (c8 + c) * 2 + 2 * tq * c * 4)
    score = 4 * tq * tk * 4               # headroom for exp / reduce temporaries
    est = stream + score + 3 * tq * c * 4 + (2 << 20)
    # never below the 32 MiB default; cap well under v7x's 64 MiB physical VMEM
    return int(min(max(est, 32 << 20), 56 << 20))


def attention_forward(x, params, *, single_pass_max_n=2048, force_flash=False,
                      tq=None, tk=None):
    """Pallas TPU forward of the SAGAN-style `Attention` module.

    Conv weights are expected pre-transposed to (C_in, C_out).
    """
    B, C, H, W = x.shape
    N = H * W
    C8 = params["wq"].shape[1]
    assert params["wq"].shape == (C, C8) and params["wv"].shape == (C, C), (
        "1x1-conv weights must be pre-transposed to (C_in, C_out)")

    # Pad the pixel axis to a multiple of 128 (masked in-kernel) instead of the
    # old full-(N, N) fallback that can exceed v7x's 64 MiB VMEM.
    N_pad = _round_up(N, 128)
    pad = N_pad - N

    # Two *free* views of the same contiguous NCHW buffer:
    #   (B, C, N): channel-major pixels -> q/k/v projections (bf16 to halve DMA)
    #   (B, N, C): raw-byte reinterpretation -> residual (torch .view quirk), f32
    x_cn = x.reshape(B, C, N).astype(jnp.bfloat16)
    x_res = x.reshape(B, N, C)
    if pad:
        x_cn = jnp.pad(x_cn, ((0, 0), (0, 0), (0, pad)))
        x_res = jnp.pad(x_res, ((0, 0), (0, pad), (0, 0)))

    wq = params["wq"].astype(jnp.bfloat16)
    wk = params["wk"].astype(jnp.bfloat16)
    wv = params["wv"].astype(jnp.bfloat16)
    bq = params["bq"].reshape(1, C8)
    bk = params["bk"].reshape(1, C8)
    bv = params["bv"].reshape(1, C)
    gamma = params["gamma"].reshape(1)

    # ---------------- pass 1: q/k/v projections (computed once) ----------------
    TP = _pick_tile(N_pad, (512, 256, 128))
    q, k, v = pl.pallas_call(
        _project_kernel,
        out_shape=(
            jax.ShapeDtypeStruct((B, N_pad, C8), jnp.bfloat16),
            jax.ShapeDtypeStruct((B, N_pad, C8), jnp.bfloat16),
            jax.ShapeDtypeStruct((B, N_pad, C), jnp.bfloat16),
        ),
        grid_spec=pltpu.PrefetchScalarGridSpec(
            num_scalar_prefetch=0,
            grid=(B, N_pad // TP),
            in_specs=[
                pl.BlockSpec((1, C, TP), lambda b, i: (b, 0, i)),   # x tile
                pl.BlockSpec((C, C8), lambda b, i: (0, 0)),         # wq
                pl.BlockSpec((1, C8), lambda b, i: (0, 0)),         # bq
                pl.BlockSpec((C, C8), lambda b, i: (0, 0)),         # wk
                pl.BlockSpec((1, C8), lambda b, i: (0, 0)),         # bk
                pl.BlockSpec((C, C), lambda b, i: (0, 0)),          # wv
                pl.BlockSpec((1, C), lambda b, i: (0, 0)),          # bv
            ],
            out_specs=[
                pl.BlockSpec((1, TP, C8), lambda b, i: (b, i, 0)),
                pl.BlockSpec((1, TP, C8), lambda b, i: (b, i, 0)),
                pl.BlockSpec((1, TP, C), lambda b, i: (b, i, 0)),
            ],
        ),
        compiler_params=pltpu.CompilerParams(
            dimension_semantics=("parallel", "parallel")),
    )(x_cn, wq, bq, wk, bk, wv, bv)

    # ---------------- pass 2: attention + residual ----------------
    out_shape = jax.ShapeDtypeStruct((B, N_pad, C), jnp.float32)
    single_pass = (N_pad <= single_pass_max_n) and not force_flash

    if single_pass:
        # Small N: one softmax over the full (TQ, N_pad) score tile; grid has
        # B * N_pad/TQ parallel iterations so both v7x TensorCores get work.
        TQ = tq if tq is not None else min(128, N_pad)
        assert N_pad % TQ == 0
        out = pl.pallas_call(
            functools.partial(_attn_single_pass_kernel, N),
            out_shape=out_shape,
            grid_spec=pltpu.PrefetchScalarGridSpec(
                num_scalar_prefetch=0,
                grid=(B, N_pad // TQ),
                in_specs=[
                    pl.BlockSpec((1, TQ, C8), lambda b, i: (b, i, 0)),     # q tile
                    pl.BlockSpec((1, N_pad, C8), lambda b, i: (b, 0, 0)),  # full K
                    pl.BlockSpec((1, N_pad, C), lambda b, i: (b, 0, 0)),   # full V
                    pl.BlockSpec((1, TQ, C), lambda b, i: (b, i, 0)),      # residual
                    pl.BlockSpec(memory_space=pltpu.MemorySpace.SMEM),     # gamma
                ],
                out_specs=pl.BlockSpec((1, TQ, C), lambda b, i: (b, i, 0)),
            ),
            compiler_params=pltpu.CompilerParams(
                dimension_semantics=("parallel", "parallel"),
                vmem_limit_bytes=_vmem_limit_bytes(TQ, N_pad, C, C8),
            ),
        )(q, k, v, x_res, gamma)
    else:
        # Large N: flash-style online softmax with larger tiles to amortize the
        # per-grid-step overhead.
        # TODO(synk): try pl.Buffered(3) on the k/v specs if DMA is still exposed.
        TQ = tq if tq is not None else _pick_tile(N_pad, (256, 128))
        TK = tk if tk is not None else _pick_tile(N_pad, (512, 256, 128))
        assert N_pad % TQ == 0 and N_pad % TK == 0
        out = pl.pallas_call(
            functools.partial(_attn_flash_kernel, N, N_pad, TK),
            out_shape=out_shape,
            grid_spec=pltpu.PrefetchScalarGridSpec(
                num_scalar_prefetch=0,
                grid=(B, N_pad // TQ, N_pad // TK),
                in_specs=[
                    pl.BlockSpec((1, TQ, C8), lambda b, i, j: (b, i, 0)),  # q tile
                    pl.BlockSpec((1, TK, C8), lambda b, i, j: (b, j, 0)),  # k tile
                    pl.BlockSpec((1, TK, C), lambda b, i, j: (b, j, 0)),   # v tile
                    pl.BlockSpec((1, TQ, C), lambda b, i, j: (b, i, 0)),   # residual
                    pl.BlockSpec(memory_space=pltpu.MemorySpace.SMEM),     # gamma
                ],
                out_specs=pl.BlockSpec((1, TQ, C), lambda b, i, j: (b, i, 0)),
                scratch_shapes=[
                    pltpu.VMEM((TQ, 1), jnp.float32),   # running row max
                    pltpu.VMEM((TQ, 1), jnp.float32),   # running denominator
                    pltpu.VMEM((TQ, C), jnp.float32),   # f32 output accumulator
                ],
            ),
            compiler_params=pltpu.CompilerParams(
                dimension_semantics=("parallel", "parallel", "arbitrary"),
                vmem_limit_bytes=_vmem_limit_bytes(TQ, TK, C, C8),
            ),
        )(q, k, v, x_res, gamma)

    # torch `out.view(*x.size())`: reinterpret contiguous (N, C) as (C, H, W).
    return out[:, :N, :].reshape(B, C, H, W)


def attention_reference(x, params):
    # Pure-JAX f32 mirror of the PyTorch forward (for correctness checking).
    B, C, H, W = x.shape
    N = H * W
    C8 = params["wq"].shape[1]
    q = jnp.einsum("co,bchw->bohw", params["wq"], x) + params["bq"].reshape(1, C8, 1, 1)
    k = jnp.einsum("co,bchw->bohw", params["wk"], x) + params["bk"].reshape(1, C8, 1, 1)
    v = jnp.einsum("co,bchw->bohw", params["wv"], x) + params["bv"].reshape(1, C, 1, 1)
    q = q.reshape(B, C8, N).transpose(0, 2, 1)      # (B, N, C8)
    k = k.reshape(B, C8, N).transpose(0, 2, 1)      # (B, N, C8)
    v = v.reshape(B, C, N)                          # (B, C, N)
    attn = jax.nn.softmax(jnp.einsum("bnc,bmc->bnm", q, k), axis=2)
    out = jnp.einsum("bnm,bcm->bnc", attn, v)       # (B, N, C)
    out = out.reshape(B, C, H, W)                   # .view() reinterpretation
    return params["gamma"].reshape(()) * out + x


if __name__ == "__main__":
    key = jax.random.PRNGKey(0)
    B, C, H, W = 2, 32, 16, 16       # in_dim = 32 -> C//8 = 4, N = 256
    C8 = C // 8
    ks = jax.random.split(key, 8)

    x = jax.random.normal(ks[0], (B, C, H, W), jnp.float32)
    params = {
        # Conv2d(C, C8, 1) weights stored pre-transposed as (C_in, C_out)
        "wq": 0.1 * jax.random.normal(ks[1], (C, C8), jnp.float32),
        "bq": 0.1 * jax.random.normal(ks[2], (1, C8), jnp.float32),
        "wk": 0.1 * jax.random.normal(ks[3], (C, C8), jnp.float32),
        "bk": 0.1 * jax.random.normal(ks[4], (1, C8), jnp.float32),
        "wv": 0.1 * jax.random.normal(ks[5], (C, C), jnp.float32),
        "bv": 0.1 * jax.random.normal(ks[6], (1, C), jnp.float32),
        # PyTorch inits gamma to 0; nonzero here so the attention path is exercised.
        "gamma": jnp.array([0.5], jnp.float32),
    }

    ref = attention_reference(x, params)

    # Default path at this size: single-pass softmax (no kv loop).
    out_single = attention_forward(x, params)
    jax.block_until_ready(out_single)

    # Flash (online-softmax) path, forced with small tiles so the kv loop has
    # multiple steps; this is the path used for large N in practice.
    out_flash = attention_forward(x, params, force_flash=True, tq=128, tk=128)
    jax.block_until_ready(out_flash)

    ok_shapes = (out_single.shape == (B, C, H, W)
                 and out_flash.shape == (B, C, H, W))
    # bf16 MXU operands + approx reciprocal -> loosened tolerance vs f32 ref.
    ok_single = bool(jnp.allclose(out_single, ref, atol=5e-2, rtol=5e-2))
    ok_flash = bool(jnp.allclose(out_flash, ref, atol=5e-2, rtol=5e-2))

    if ok_shapes and ok_single and ok_flash:
        print("KERNEL_OK")
    else:
        print("MISMATCH single_err=%.3e flash_err=%.3e" % (
            float(jnp.max(jnp.abs(out_single - ref))),
            float(jnp.max(jnp.abs(out_flash - ref)))))
</pallas_src>

<mosaic_0001>
module attributes {stable_mosaic.version = 11 : i64} {
  func.func @_project_kernel(%arg0: i32, %arg1: i32, %arg2: memref<1x32x256xbf16, #tpu.memory_space<vmem>>, %arg3: memref<32x4xbf16, #tpu.memory_space<vmem>>, %arg4: memref<1x4xf32, #tpu.memory_space<vmem>>, %arg5: memref<32x4xbf16, #tpu.memory_space<vmem>>, %arg6: memref<1x4xf32, #tpu.memory_space<vmem>>, %arg7: memref<32x32xbf16, #tpu.memory_space<vmem>>, %arg8: memref<1x32xf32, #tpu.memory_space<vmem>>, %arg9: memref<1x256x4xbf16, #tpu.memory_space<vmem>>, %arg10: memref<1x256x4xbf16, #tpu.memory_space<vmem>>, %arg11: memref<1x256x32xbf16, #tpu.memory_space<vmem>>) attributes {dimension_semantics = [#tpu.dimension_semantics<parallel>, #tpu.dimension_semantics<parallel>], iteration_bounds = array<i64: 2, 1>, scalar_prefetch = 0 : i64, scratch_operands = 0 : i64, tpu.core_type = #tpu.core_type<tc>, window_params = [{transform_indices = @transform_0, window_bounds = array<i64: 1, 32, 256>}, {pipeline_mode = #tpu.pipeline_mode<synchronous>, transform_indices = @transform_1, window_bounds = array<i64: 32, 4>}, {pipeline_mode = #tpu.pipeline_mode<synchronous>, transform_indices = @transform_2, window_bounds = array<i64: 1, 4>}, {pipeline_mode = #tpu.pipeline_mode<synchronous>, transform_indices = @transform_3, window_bounds = array<i64: 32, 4>}, {pipeline_mode = #tpu.pipeline_mode<synchronous>, transform_indices = @transform_4, window_bounds = array<i64: 1, 4>}, {pipeline_mode = #tpu.pipeline_mode<synchronous>, transform_indices = @transform_5, window_bounds = array<i64: 32, 32>}, {pipeline_mode = #tpu.pipeline_mode<synchronous>, transform_indices = @transform_6, window_bounds = array<i64: 1, 32>}, {transform_indices = @transform_7, window_bounds = array<i64: 1, 256, 4>}, {transform_indices = @transform_8, window_bounds = array<i64: 1, 256, 4>}, {transform_indices = @transform_9, window_bounds = array<i64: 1, 256, 32>}]} {
    %c0 = arith.constant 0 : index
    %c0_0 = arith.constant 0 : index
    %c0_1 = arith.constant 0 : index
    %0 = vector.load %arg2[%c0, %c0_0, %c0_1] : memref<1x32x256xbf16, #tpu.memory_space<vmem>>, vector<1x32x256xbf16>
    %1 = vector.shape_cast %0 : vector<1x32x256xbf16> to vector<32x256xbf16>
    %2 = tpu.transpose %1, [1, 0] : vector<32x256xbf16> -> vector<256x32xbf16>
    %c0_2 = arith.constant 0 : index
    %c0_3 = arith.constant 0 : index
    %3 = vector.load %arg3[%c0_2, %c0_3] : memref<32x4xbf16, #tpu.memory_space<vmem>>, vector<32x4xbf16>
    %cst = arith.constant dense<0.000000e+00> : vector<256x4xf32>
    %4 = tpu.matmul %2, %3, %cst {dimension_numbers = #tpu.dot_dimension_numbers<[1], [0], [0], [1], [0, 0, 1, 1], [], []>} : vector<256x32xbf16>, vector<32x4xbf16>, vector<256x4xf32> -> vector<256x4xf32>
    %c0_4 = arith.constant 0 : index
    %c0_5 = arith.constant 0 : index
    %5 = vector.load %arg4[%c0_4, %c0_5] : memref<1x4xf32, #tpu.memory_space<vmem>>, vector<1x4xf32>
    %6 = vector.broadcast %5 : vector<1x4xf32> to vector<256x4xf32>
    %7 = arith.addf %4, %6 : vector<256x4xf32>
    %c0_6 = arith.constant 0 : index
    %c0_7 = arith.constant 0 : index
    %8 = vector.load %arg5[%c0_6, %c0_7] : memref<32x4xbf16, #tpu.memory_space<vmem>>, vector<32x4xbf16>
    %cst_8 = arith.constant dense<0.000000e+00> : vector<256x4xf32>
    %9 = tpu.matmul %2, %8, %cst_8 {dimension_numbers = #tpu.dot_dimension_numbers<[1], [0], [0], [1], [0, 0, 1, 1], [], []>} : vector<256x32xbf16>, vector<32x4xbf16>, vector<256x4xf32> -> vector<256x4xf32>
    %c0_9 = arith.constant 0 : index
    %c0_10 = arith.constant 0 : index
    %10 = vector.load %arg6[%c0_9, %c0_10] : memref<1x4xf32, #tpu.memory_space<vmem>>, vector<1x4xf32>
    %11 = vector.broadcast %10 : vector<1x4xf32> to vector<256x4xf32>
    %12 = arith.addf %9, %11 : vector<256x4xf32>
    %c0_11 = arith.constant 0 : index
    %c0_12 = arith.constant 0 : index
    %13 = vector.load %arg7[%c0_11, %c0_12] : memref<32x32xbf16, #tpu.memory_space<vmem>>, vector<32x32xbf16>
    %cst_13 = arith.constant dense<0.000000e+00> : vector<256x32xf32>
    %14 = tpu.matmul %2, %13, %cst_13 {dimension_numbers = #tpu.dot_dimension_numbers<[1], [0], [0], [1], [0, 0, 1, 1], [], []>} : vector<256x32xbf16>, vector<32x32xbf16>, vector<256x32xf32> -> vector<256x32xf32>
    %c0_14 = arith.constant 0 : index
    %c0_15 = arith.constant 0 : index
    %15 = vector.load %arg8[%c0_14, %c0_15] : memref<1x32xf32, #tpu.memory_space<vmem>>, vector<1x32xf32>
    %16 = vector.broadcast %15 : vector<1x32xf32> to vector<256x32xf32>
    %17 = arith.addf %14, %16 : vector<256x32xf32>
    %18 = arith.truncf %7 : vector<256x4xf32> to vector<256x4xbf16>
    %c0_16 = arith.constant 0 : index
    %c0_17 = arith.constant 0 : index
    %c0_18 = arith.constant 0 : index
    %19 = vector.load %arg9[%c0_16, %c0_17, %c0_18] : memref<1x256x4xbf16, #tpu.memory_space<vmem>>, vector<1x256x4xbf16>
    %20 = vector.shape_cast %19 : vector<1x256x4xbf16> to vector<256x4xbf16>
    %21 = vector.shape_cast %18 : vector<256x4xbf16> to vector<1x256x4xbf16>
    tpu.vector_store %arg9[%c0_16, %c0_17, %c0_18], %21 {strides = array<i32>} : memref<1x256x4xbf16, #tpu.memory_space<vmem>>, vector<1x256x4xbf16>,
    %22 = arith.truncf %12 : vector<256x4xf32> to vector<256x4xbf16>
    %c0_19 = arith.constant 0 : index
    %c0_20 = arith.constant 0 : index
    %c0_21 = arith.constant 0 : index
    %23 = vector.load %arg10[%c0_19, %c0_20, %c0_21] : memref<1x256x4xbf16, #tpu.memory_space<vmem>>, vector<1x256x4xbf16>
    %24 = vector.shape_cast %23 : vector<1x256x4xbf16> to vector<256x4xbf16>
    %25 = vector.shape_cast %22 : vector<256x4xbf16> to vector<1x256x4xbf16>
    tpu.vector_store %arg10[%c0_19, %c0_20, %c0_21], %25 {strides = array<i32>} : memref<1x256x4xbf16, #tpu.memory_space<vmem>>, vector<1x256x4xbf16>,
    %26 = arith.truncf %17 : vector<256x32xf32> to vector<256x32xbf16>
    %c0_22 = arith.constant 0 : index
    %c0_23 = arith.constant 0 : index
    %c0_24 = arith.constant 0 : index
    %27 = vector.load %arg11[%c0_22, %c0_23, %c0_24] : memref<1x256x32xbf16, #tpu.memory_space<vmem>>, vector<1x256x32xbf16>
    %28 = vector.shape_cast %27 : vector<1x256x32xbf16> to vector<256x32xbf16>
    %29 = vector.shape_cast %26 : vector<256x32xbf16> to vector<1x256x32xbf16>
    tpu.vector_store %arg11[%c0_22, %c0_23, %c0_24], %29 {strides = array<i32>} : memref<1x256x32xbf16, #tpu.memory_space<vmem>>, vector<1x256x32xbf16>,
    return
  }
  func.func @transform_0(%arg0: i32, %arg1: i32) -> (i32, i32, i32) {
    %c0_i32 = arith.constant 0 : i32
    %c0_i32_0 = arith.constant 0 : i32
    return %arg0, %c0_i32, %arg1 : i32, i32, i32
  }
  func.func @transform_1(%arg0: i32, %arg1: i32) -> (i32, i32) {
    %c0_i32 = arith.constant 0 : i32
    %c0_i32_0 = arith.constant 0 : i32
    %c0_i32_1 = arith.constant 0 : i32
    return %c0_i32, %c0_i32_0 : i32, i32
  }
  func.func @transform_2(%arg0: i32, %arg1: i32) -> (i32, i32) {
    %c0_i32 = arith.constant 0 : i32
    %c0_i32_0 = arith.constant 0 : i32
    %c0_i32_1 = arith.constant 0 : i32
    return %c0_i32, %c0_i32_0 : i32, i32
  }
  func.func @transform_3(%arg0: i32, %arg1: i32) -> (i32, i32) {
    %c0_i32 = arith.constant 0 : i32
    %c0_i32_0 = arith.constant 0 : i32
    %c0_i32_1 = arith.constant 0 : i32
    return %c0_i32, %c0_i32_0 : i32, i32
  }
  func.func @transform_4(%arg0: i32, %arg1: i32) -> (i32, i32) {
    %c0_i32 = arith.constant 0 : i32
    %c0_i32_0 = arith.constant 0 : i32
    %c0_i32_1 = arith.constant 0 : i32
    return %c0_i32, %c0_i32_0 : i32, i32
  }
  func.func @transform_5(%arg0: i32, %arg1: i32) -> (i32, i32) {
    %c0_i32 = arith.constant 0 : i32
    %c0_i32_0 = arith.constant 0 : i32
    %c0_i32_1 = arith.constant 0 : i32
    return %c0_i32, %c0_i32_0 : i32, i32
  }
  func.func @transform_6(%arg0: i32, %arg1: i32) -> (i32, i32) {
    %c0_i32 = arith.constant 0 : i32
    %c0_i32_0 = arith.constant 0 : i32
    %c0_i32_1 = arith.constant 0 : i32
    return %c0_i32, %c0_i32_0 : i32, i32
  }
  func.func @transform_7(%arg0: i32, %arg1: i32) -> (i32, i32, i32) {
    %c0_i32 = arith.constant 0 : i32
    %c0_i32_0 = arith.constant 0 : i32
    return %arg0, %arg1, %c0_i32 : i32, i32, i32
  }
  func.func @transform_8(%arg0: i32, %arg1: i32) -> (i32, i32, i32) {
    %c0_i32 = arith.constant 0 : i32
    %c0_i32_0 = arith.constant 0 : i32
    return %arg0, %arg1, %c0_i32 : i32, i32, i32
  }
  func.func @transform_9(%arg0: i32, %arg1: i32) -> (i32, i32, i32) {
    %c0_i32 = arith.constant 0 : i32
    %c0_i32_0 = arith.constant 0 : i32
    return %arg0, %arg1, %c0_i32 : i32, i32, i32
  }
}

</mosaic_0001>

<bundles_post_ra>
// kernel: tpu_custom_call.1
= control target key start
LH: loop header
LB: loop body
LE: loop exit
PB: predicated region body
PF: predicated region fallthrough
CT: control target
= control target key end

     0   :  { %15 = vsyncpa [#allocation3], 0  ;;  %s2888_s0 = inlined_call_operand.hbm [shape: bf16[2,32,256], index: 0, kind: input, shape index: {}]   ;;  %s2889_s1 = inlined_call_operand.vmem [shape: bf16[32,4], index: 1, kind: input, shape index: {}]   ;;  %s2890_s2 = inlined_call_operand.vmem [shape: f32[1,4], index: 2, kind: input, shape index: {}]   ;;  %s2891_s3 = inlined_call_operand.vmem [shape: bf16[32,4], index: 3, kind: input, shape index: {}]   ;;  %s2892_s4 = inlined_call_operand.vmem [shape: f32[1,4], index: 4, kind: input, shape index: {}]   ;;  %s2893_s5 = inlined_call_operand.vmem [shape: bf16[32,32], index: 5, kind: input, shape index: {}]   ;;  %s2894_s6 = inlined_call_operand.vmem [shape: f32[1,32], index: 6, kind: input, shape index: {}]   ;;  %s2895_s7 = inlined_call_operand.vmem [shape: bf16[2,256,4], index: 7, kind: output, shape index: {0}]   ;;  %s2896_s8 = inlined_call_operand.vmem [shape: bf16[2,256,4], index: 8, kind: output, shape index: {1}]   ;;  %s2897_s9 = inlined_call_operand.vmem [shape: bf16[2,256,32], index: 9, kind: output, shape index: {2}]  }
   0x1   :  { %17 = vsyncpa [#allocation3 + $0x1], 0  ;;  %s2406_s30 = smov 0   ;;  %s2408_s10 = smov 0  }
   0x2   :  { %s2410_s11 = smov 0   ;;  %s2412_s12 = smov 0  }
   0x3   :  { %s2414_s13 = smov 0   ;;  %s2416_s14 = smov 0  }
   0x4 LB: > { %s1763_s15 = sadd.s32 4294967295, %s2351_s14   ;;  %s35_s16 = sadd.s32 1, %s2347_s13  ;;  %s2351_s14 = sphi %s2416_s14, %s23_s14   ;;  %s2347_s13 = sphi %s2414_s13, %s2908_s13   ;;  %s2343_s12 = sphi %s2412_s12, %s2907_s12   ;;  %s2339_s11 = sphi %s2410_s11, %s2906_s11   ;;  %s2335_s10 = sphi %s2408_s10, %s2905_s10   ;;  %s2331_s30 = sphi %s2406_s30, %s2904_s30  }
   0x5   : > { %p37_p0 = scmp.ge.s32.totalorder %s35_s16, 2  ;;  %s44_s17 = sadd.s32 1, %s2339_s11 }
   0x6   : > { %p51_p1 = scmp.ne.s32.totalorder %s2339_s11, %s2335_s10  ;;  %p52_p2 = scmp.eq.s32.totalorder %s2351_s14, 0 }
   0x7   : > { %s2910_s16 = smov (%p37_p0, %s35_s16), 0  ;;  %p57_p4 = scmp.ne.s32.totalorder %s2335_s10, %s2331_s30 }
   0x8   : > { %2899 = sst [smem:[#allocation5_spill]] %s2910_s16  ;;  %p2442_p3 = por %p52_p2, %p51_p1 }
   0x9   : > { %s39_s19 = ssub.s32 %s2347_s13, %s2910_s16  ;;  %p58_p5 = scmp.eq.s32.totalorder %s1763_s15, 0 }
   0xa   : > { %p42_p6 = scmp.eq.s32.totalorder %s39_s19, 0  ;;  %p2209_p8 = scmp.lt.s32.totalorder %s2351_s14, 2 }
   0xb   : > { %p2449_p7 = por %p58_p5, %p57_p4  ;;  %s309_s22 = sand.u32 1, %s2339_s11  }
   0xc   : > { %s2455_s21 = scalar_select %p42_p6, %s2339_s11, %s44_s17  }
   0xd   : > { %s1937_s23 = sshll.u32 %s2347_s13, 9  ;;  %s1767_s24 = sshll.u32 %s309_s22, 5 }
   0xe   : > { %s321_s27 = scalar_lea.hbm %s2888_s0, %s1937_s23  ;;  %s313_s28 = scalar_lea.vmem [#allocation2], %s1767_s24 }
   0xf   : > { %s322_s29 = sshll.u32 %s313_s28, 4  ;;  %p2464_p9 = pnand %p2209_p8, %p2442_p3  ;;  %s323_s29 = int_to_ptr.vmem [resolvable:$true] %s322_s29 }
  0x10   : > { %s310_s15 = scalar_lea.sflag [#allocation3], %s309_s22  ;;  %s2286_s17 = scalar_lea.vmem %s323_s29, 512 }
  0x11   : > { %p2275_p10 = pneg %p2464_p9  ;;  %p2287_p11 = scmp.ne.s32.totalorder %s323_s29, %s2286_s17 }
  0x12   : > { %s2353_s19 = smov [#allocation2]  }
  0x13   : > { %p2289_p12 = pnand %p2287_p11, %p2275_p10  ;;  %s2291_s16 = sshll.u32 %s2353_s19, 4  ;;  %s2292_s16 = int_to_ptr.vmem [resolvable:$false] %s2291_s16 }
  0x14   : > { %s2293_s23 = scalar_lea.vmem %s2292_s16, 1024  ;;  %p2294_p0 = scmp.lt.s32.totalorder %s323_s29, %s2292_s16 }
  0x15   : > { %p2290_p13 = pneg %p2289_p12  ;;  %p2295_p1 = scmp.lt.s32.totalorder %s2293_s23, %s2286_s17 }
  0x17   : > { %p2296_p2 = por %p2295_p1, %p2294_p0 }
  0x19   : > { %p2297_p3 = pnand %p2296_p2, %p2290_p13 }
  0x1b   : > { %2300 = shalt.err (!%p2297_p3)
}
  0x1c   : > { %s2354_s18 = smov 128   ;;  %s2355_s22 = smov 8  }
  0x1d   : > { %2208 = dma.hbm_to_vmem [thread:$0]  (!%p2464_p9), %s321_s27, 512, %s323_s29, %s310_s15, %s2354_s18, %s2354_s18, %s2355_s22  }
  0x1e   : > { %p1770_p4 = scmp.ge.s32.totalorder %s2351_s14, 1  ;;  %p330_p5 = scmp.lt.s32.totalorder %s2351_s14, 3 }
  0x20   : > { %p331_p6 = pnand %p1770_p4, %p330_p5 }
  0x21   : > { %s336_s24 = sand.u32 (!%p331_p6), 1, %s2335_s10  }
  0x22   : > { %334 = sbr.rel (%p331_p6) target bundleno = 437 (0x1b5), region = 48  ;;  %s1771_s25 = sshll.u32 (!%p331_p6), %s336_s24, 5 }
  0x23   : > { %s337_s16 = scalar_lea.sflag (!%p331_p6), [#allocation3], %s336_s24  ;;  %s340_s26 = scalar_lea.vmem (!%p331_p6), [#allocation2], %s1771_s25 }
  0x27   : > { %2326 = dma.done.wait (%p2449_p7), %s337_s16, 512  }
  0x28   : > { %2328 = vsyncadd (%p2449_p7), %s337_s16, 4294966784  ;;  %v2261_v0 = vld [vmem:[%s340_s26 + $0x4] ss:$8 sps:$4 sm:$0xff]   ;;  %v2263_v1 = vld [vmem:[%s340_s26] ss:$8 sps:$4 sm:$0xff]   ;;  %vm508_vm0 = vcmask 261120  }
  0x29   : > { %469 = vxpose.xlu1.c.b16.start [1/2] (short) %v2261_v0, 128  ;;  %v2264_v2 = vld [vmem:[%s340_s26 + $0x14] ss:$8 sps:$4 sm:$0xff]   ;;  %v2266_v3 = vld [vmem:[%s340_s26 + $0x10] ss:$8 sps:$4 sm:$0xff]   ;;  %453 = vxpose.xlu0.c.b16.start [1/2] (short) %v2263_v1, 128  ;;  %v2267_v4 = vld [vmem:[%s2889_s1 + $0x8] sm:$0xff]   ;;  %p399_p7 = scmp.lt.s32.totalorder %s2343_s12, 1 }
  0x2a   : > { %v2268_v5 = vld [vmem:[%s2889_s1] sm:$0xff]   ;;  %2091 = vmatprep.subr.bf16.mxu0 %v2267_v4  ;;  %2199 = vmatprep.subr.bf16.mxu1 %v2267_v4  ;;  %v2270_v6 = vld [vmem:[%s2893_s5 + $0x8] sm:$0xff]   ;;  %vm1214_vm1 = vcmask 27648   ;;  %vm1535_vm2 = vcmask 257024  }
  0x2b   : > { %2092 = vmatpush3.bf16.msra.mxu0 %v2267_v4  ;;  %2201 = vmatpush3.bf16.msra.mxu1 %v2267_v4  ;;  %v2269_v7 = vld [vmem:[%s2891_s3 + $0x8] sm:$0xff]   ;;  %v2271_v10 = vld [vmem:[%s2891_s3] sm:$0xff]   ;;  %s2912_s12 = smov (!%p399_p7, %s2343_s12), 1 }
  0x2c   : > { %2093 = vmatprep.subr.bf16.mxu0 %v2268_v5  ;;  %2200 = vmatprep.subr.bf16.mxu1 %v2268_v5  ;;  %v2272_v12 = vld [vmem:[%s2893_s5] sm:$0xff]   ;;  %s2552_s26 = sshll.u32 %s2912_s12, 7 }
  0x2d   : > { %470 = vxpose.xlu1.c.b16.end [2/2] (short) %v2264_v2, 128  ;;  %454 = vxpose.xlu0.c.b16.end [2/2] (short) %v2266_v3, 128  ;;  %v2550_v26 = vld [vmem:[%s2890_s2] ss:$0 sm:$0xff]  ;;  %s2559_s29 = scalar_lea.vmem %s2895_s7, %s2552_s26  ;;  %s2667_s23 = scalar_lea.vmem %s2896_s8, %s2552_s26 }
  0x2e   : > { %s2676_s24 = scalar_lea.vmem %s2897_s9, %s2552_s26 }
  0x2f   : > { %2094 = vmatpush3.bf16.msra.mxu0 %v2268_v5  ;;  %2202 = vmatpush3.bf16.msra.mxu1 %v2268_v5 }
  0x30   : > { %2163 = vmatprep.subr.bf16.mxu0 %v2270_v6  ;;  %2127 = vmatprep.subr.bf16.mxu1 %v2269_v7 }
  0x8b   : > { %v477_v8 = vpop.trf.xlu1  ;;  %v461_v9 = vpop.trf.xlu0 }
  0x8c   : > { %2111 = vmatprep.mubr.msk.bf16.mxu1 %vm508_vm0, %v477_v8  ;;  %2095 = vmatprep.mubr.msk.bf16.mxu0 %vm508_vm0, %v461_v9 }
  0x8f   : > { %v478_v11 = vpop.trf.xlu1  ;;  %v462_v13 = vpop.trf.xlu0 }
  0x90   : > { %2112 = vmatmul.mubr.msk.bf16.vlgmr.msra.gmra.mxu1 %vm508_vm0, %v478_v11  ;;  %2096 = vmatmul.mubr.msk.bf16.vlgmr.msra.gmra.mxu0 %vm508_vm0, %v462_v13 }
  0x91   : > { %2128 = vmatpush3.bf16.msra.mxu1 %v2269_v7  ;;  %2164 = vmatpush3.bf16.msra.mxu0 %v2270_v6 }
  0x92   : > { %2129 = vmatprep.subr.bf16.mxu1 %v2271_v10  ;;  %2165 = vmatprep.subr.bf16.mxu0 %v2272_v12 }
  0x93   : > { %v479_v14 = vpop.trf.xlu1  ;;  %v463_v15 = vpop.trf.xlu0 }
  0x94   : > { %2115 = vmatprep.mubr.msk.bf16.mxu1 %vm508_vm0, %v479_v14  ;;  %2099 = vmatprep.mubr.msk.bf16.mxu0 %vm508_vm0, %v463_v15 }
  0x95   : > { %2130 = vmatpush3.bf16.msra.mxu1 %v2271_v10  ;;  %2166 = vmatpush3.bf16.msra.mxu0 %v2272_v12 }
  0x97   : > { %v480_v16 = vpop.trf.xlu1  ;;  %v464_v17 = vpop.trf.xlu0 }
  0x98   : > { %2116 = vmatmul.mubr.msk.bf16.gmra.mxu1 %vm508_vm0, %v480_v16  ;;  %2100 = vmatmul.mubr.msk.bf16.gmra.mxu0 %vm508_vm0, %v464_v17 }
  0x9b   : > { %v481_v18 = vpop.trf.xlu1  ;;  %v465_v19 = vpop.trf.xlu0 }
  0x9c   : > { %2119 = vmatprep.mubr.msk.bf16.mxu1 %vm508_vm0, %v481_v18  ;;  %2103 = vmatprep.mubr.msk.bf16.mxu0 %vm508_vm0, %v465_v19 }
  0x9f   : > { %v482_v20 = vpop.trf.xlu1  ;;  %v466_v21 = vpop.trf.xlu0 }
  0xa0   : > { %2120 = vmatmul.mubr.msk.bf16.gmra.mxu1 %vm508_vm0, %v482_v20  ;;  %2104 = vmatmul.mubr.msk.bf16.gmra.mxu0 %vm508_vm0, %v466_v21 }
  0xa3   : > { %v483_v22 = vpop.trf.xlu1  ;;  %v467_v23 = vpop.trf.xlu0 }
  0xa4   : > { %2123 = vmatprep.mubr.msk.bf16.mxu1 %vm508_vm0, %v483_v22  ;;  %2107 = vmatprep.mubr.msk.bf16.mxu0 %vm508_vm0, %v467_v23 }
  0xa7   : > { %v484_v24 = vpop.trf.xlu1  ;;  %v468_v25 = vpop.trf.xlu0 }
  0xa8   : > { %2124 = vmatmul.mubr.msk.bf16.gmra.mxu1 %vm508_vm0, %v484_v24  ;;  %2108 = vmatmul.mubr.msk.bf16.gmra.mxu0 %vm508_vm0, %v468_v25 }
  0xa9   : > { %2131 = vmatprep.mubr.msk.bf16.mxu1 %vm508_vm0, %v461_v9  ;;  %2167 = vmatprep.mubr.msk.bf16.mxu0 %vm508_vm0, %v461_v9 }
  0xb0   : > { %2132 = vmatmul.mubr.msk.bf16.vlgmr.msra.gmra.mxu1 %vm508_vm0, %v462_v13  ;;  %2168 = vmatmul.mubr.msk.bf16.vlgmr.msra.gmra.mxu0 %vm508_vm0, %v462_v13 }
  0xb1   : > { %2135 = vmatprep.mubr.msk.bf16.mxu1 %vm508_vm0, %v463_v15  ;;  %2171 = vmatprep.mubr.msk.bf16.mxu0 %vm508_vm0, %v463_v15 }
  0xb8   : > { %2136 = vmatmul.mubr.msk.bf16.gmra.mxu1 %vm508_vm0, %v464_v17  ;;  %2172 = vmatmul.mubr.msk.bf16.gmra.mxu0 %vm508_vm0, %v464_v17 }
  0xb9   : > { %2139 = vmatprep.mubr.msk.bf16.mxu1 %vm508_vm0, %v465_v19  ;;  %2175 = vmatprep.mubr.msk.bf16.mxu0 %vm508_vm0, %v465_v19 }
  0xc0   : > { %2140 = vmatmul.mubr.msk.bf16.gmra.mxu1 %vm508_vm0, %v466_v21  ;;  %2176 = vmatmul.mubr.msk.bf16.gmra.mxu0 %vm508_vm0, %v466_v21 }
  0xc1   : > { %2143 = vmatprep.mubr.msk.bf16.mxu1 %vm508_vm0, %v467_v23  ;;  %2179 = vmatprep.mubr.msk.bf16.mxu0 %vm508_vm0, %v467_v23 }
  0xc8   : > { %2144 = vmatmul.mubr.msk.bf16.gmra.mxu1 %vm508_vm0, %v468_v25  ;;  %2180 = vmatmul.mubr.msk.bf16.gmra.mxu0 %vm508_vm0, %v468_v25 }
  0xc9   : > { %2147 = vmatprep.mubr.msk.bf16.mxu1 %vm508_vm0, %v477_v8  ;;  %2183 = vmatprep.mubr.msk.bf16.mxu0 %vm508_vm0, %v477_v8 }
  0xd0   : > { %2148 = vmatmul.mubr.msk.bf16.gmra.mxu1 %vm508_vm0, %v478_v11  ;;  %2184 = vmatmul.mubr.msk.bf16.gmra.mxu0 %vm508_vm0, %v478_v11 }
  0xd1   : > { %2151 = vmatprep.mubr.msk.bf16.mxu1 %vm508_vm0, %v479_v14  ;;  %2187 = vmatprep.mubr.msk.bf16.mxu0 %vm508_vm0, %v479_v14 }
  0xd8   : > { %2152 = vmatmul.mubr.msk.bf16.gmra.mxu1 %vm508_vm0, %v480_v16  ;;  %2188 = vmatmul.mubr.msk.bf16.gmra.mxu0 %vm508_vm0, %v480_v16 }
  0xd9   : > { %2155 = vmatprep.mubr.msk.bf16.mxu1 %vm508_vm0, %v481_v18  ;;  %2191 = vmatprep.mubr.msk.bf16.mxu0 %vm508_vm0, %v481_v18 }
  0xe0   : > { %2156 = vmatmul.mubr.msk.bf16.gmra.mxu1 %vm508_vm0, %v482_v20  ;;  %2192 = vmatmul.mubr.msk.bf16.gmra.mxu0 %vm508_vm0, %v482_v20 }
  0xe1   : > { %2159 = vmatprep.mubr.msk.bf16.mxu1 %vm508_vm0, %v483_v22  ;;  %2195 = vmatprep.mubr.msk.bf16.mxu0 %vm508_vm0, %v483_v22 }
  0xe8   : > { %2160 = vmatmul.mubr.msk.bf16.gmra.mxu1 %vm508_vm0, %v484_v24  ;;  %2196 = vmatmul.mubr.msk.bf16.gmra.mxu0 %vm508_vm0, %v484_v24 }
 0x150   : > { %v2113_v27 = vpop.f32.mrf.mxu1  ;;  %v2097_v28 = vpop.f32.mrf.mxu0 }
 0x151   : > { %v664_v29 = vadd.f32 %v2113_v27, %v2550_v26  ;;  %v600_v30 = vadd.f32 %v2097_v28, %v2550_v26 }
 0x152   : > { %v655_v31 = vpop.f32.mrf.mxu1  ;;  %v591_v33 = vpop.f32.mrf.mxu0 }
 0x153   : > { %v1959_v32 = vpack.c.bf16 %v664_v29, %v664_v29  ;;  %v656_v34 = vadd.f32 %v2550_v26, %v655_v31  ;;  %v1943_v35 = vpack.c.bf16 %v600_v30, %v600_v30  ;;  %v592_v36 = vadd.f32 %v2550_v26, %v591_v33 }
 0x154   : > { %v2114_v37 = vpop.f32.mrf.mxu1  ;;  %v2098_v39 = vpop.f32.mrf.mxu0 }
 0x155   : > { %1233 = vst.msk [vmem:[%s2559_s29 + $0x48] sm:$0xf] %vm1214_vm1, %v1959_v32  ;;  %v1957_v38 = vpack.c.bf16 %v656_v34, %v656_v34  ;;  %v667_v40 = vadd.f32 %v2114_v37, %v2550_v26  ;;  %1217 = vst.msk [vmem:[%s2559_s29 + $0x8] sm:$0xf] %vm1214_vm1, %v1943_v35  ;;  %v1941_v41 = vpack.c.bf16 %v592_v36, %v592_v36 }
 0x156   : > { %v603_v42 = vadd.f32 %v2098_v39, %v2550_v26  ;;  %v658_v43 = vpop.f32.mrf.mxu1  ;;  %v594_v45 = vpop.f32.mrf.mxu0 }
 0x157   : > { %1231 = vst.msk [vmem:[%s2559_s29 + $0x40] sm:$0xf] %vm1214_vm1, %v1957_v38  ;;  %v1960_v44 = vpack.c.bf16 %v667_v40, %v667_v40  ;;  %v659_v46 = vadd.f32 %v2550_v26, %v658_v43  ;;  %1215 = vst.msk [vmem:[%s2559_s29] sm:$0xf] %vm1214_vm1, %v1941_v41  ;;  %v595_v48 = vadd.f32 %v2550_v26, %v594_v45 }
 0x158   : > { %v1944_v47 = vpack.c.bf16 %v603_v42, %v603_v42  ;;  %v2117_v49 = vpop.f32.mrf.mxu1  ;;  %v2101_v51 = vpop.f32.mrf.mxu0 }
 0x159   : > { %1234 = vst.msk [vmem:[%s2559_s29 + $0x4c] sm:$0xf] %vm1214_vm1, %v1960_v44  ;;  %v1958_v50 = vpack.c.bf16 %v659_v46, %v659_v46  ;;  %v680_v52 = vadd.f32 %v2117_v49, %v2550_v26  ;;  %v1942_v53 = vpack.c.bf16 %v595_v48, %v595_v48  ;;  %v616_v54 = vadd.f32 %v2101_v51, %v2550_v26 }
 0x15a   : > { %1218 = vst.msk [vmem:[%s2559_s29 + $0xc] sm:$0xf] %vm1214_vm1, %v1944_v47  ;;  %v671_v55 = vpop.f32.mrf.mxu1  ;;  %v607_v57 = vpop.f32.mrf.mxu0 }
 0x15b   : > { %1232 = vst.msk [vmem:[%s2559_s29 + $0x44] sm:$0xf] %vm1214_vm1, %v1958_v50  ;;  %v1963_v56 = vpack.c.bf16 %v680_v52, %v680_v52  ;;  %v672_v58 = vadd.f32 %v2550_v26, %v671_v55  ;;  %1216 = vst.msk [vmem:[%s2559_s29 + $0x4] sm:$0xf] %vm1214_vm1, %v1942_v53  ;;  %v1947_v59 = vpack.c.bf16 %v616_v54, %v616_v54  ;;  %v2645_v53 = vld [vmem:[%s2892_s4] ss:$0 sm:$0xff] }
 0x15c   : > { %v608_v60 = vadd.f32 %v2550_v26, %v607_v57  ;;  %v2118_v61 = vpop.f32.mrf.mxu1  ;;  %v2102_v63 = vpop.f32.mrf.mxu0  ;;  %v2653_v57 = vld [vmem:[%s2894_s6] ss:$0 sm:$0xff] }
 0x15d   : > { %1237 = vst.msk [vmem:[%s2559_s29 + $0x58] sm:$0xf] %vm1214_vm1, %v1963_v56  ;;  %v1961_v62 = vpack.c.bf16 %v672_v58, %v672_v58  ;;  %v683_v0 = vadd.f32 %v2118_v61, %v2550_v26  ;;  %1221 = vst.msk [vmem:[%s2559_s29 + $0x18] sm:$0xf] %vm1214_vm1, %v1947_v59  ;;  %v619_v2 = vadd.f32 %v2102_v63, %v2550_v26 }
 0x15e   : > { %v1945_v1 = vpack.c.bf16 %v608_v60, %v608_v60  ;;  %v674_v3 = vpop.f32.mrf.mxu1  ;;  %v610_v5 = vpop.f32.mrf.mxu0 }
 0x15f   : > { %1235 = vst.msk [vmem:[%s2559_s29 + $0x50] sm:$0xf] %vm1214_vm1, %v1961_v62  ;;  %v1964_v4 = vpack.c.bf16 %v683_v0, %v683_v0  ;;  %v675_v6 = vadd.f32 %v2550_v26, %v674_v3  ;;  %v1948_v7 = vpack.c.bf16 %v619_v2, %v619_v2  ;;  %v611_v8 = vadd.f32 %v2550_v26, %v610_v5 }
 0x160   : > { %1219 = vst.msk [vmem:[%s2559_s29 + $0x10] sm:$0xf] %vm1214_vm1, %v1945_v1  ;;  %v2121_v9 = vpop.f32.mrf.mxu1  ;;  %v2105_v11 = vpop.f32.mrf.mxu0 }
 0x161   : > { %1238 = vst.msk [vmem:[%s2559_s29 + $0x5c] sm:$0xf] %vm1214_vm1, %v1964_v4  ;;  %v1962_v10 = vpack.c.bf16 %v675_v6, %v675_v6  ;;  %v696_v12 = vadd.f32 %v2121_v9, %v2550_v26  ;;  %1222 = vst.msk [vmem:[%s2559_s29 + $0x1c] sm:$0xf] %vm1214_vm1, %v1948_v7  ;;  %v1946_v13 = vpack.c.bf16 %v611_v8, %v611_v8 }
 0x162   : > { %v632_v14 = vadd.f32 %v2105_v11, %v2550_v26  ;;  %v687_v15 = vpop.f32.mrf.mxu1  ;;  %v623_v17 = vpop.f32.mrf.mxu0 }
 0x163   : > { %1236 = vst.msk [vmem:[%s2559_s29 + $0x54] sm:$0xf] %vm1214_vm1, %v1962_v10  ;;  %v1967_v16 = vpack.c.bf16 %v696_v12, %v696_v12  ;;  %v688_v18 = vadd.f32 %v2550_v26, %v687_v15  ;;  %1220 = vst.msk [vmem:[%s2559_s29 + $0x14] sm:$0xf] %vm1214_vm1, %v1946_v13  ;;  %v624_v20 = vadd.f32 %v2550_v26, %v623_v17 }
 0x164   : > { %v1951_v19 = vpack.c.bf16 %v632_v14, %v632_v14  ;;  %v2122_v21 = vpop.f32.mrf.mxu1  ;;  %v2106_v23 = vpop.f32.mrf.mxu0 }
 0x165   : > { %1241 = vst.msk [vmem:[%s2559_s29 + $0x68] sm:$0xf] %vm1214_vm1, %v1967_v16  ;;  %v1965_v22 = vpack.c.bf16 %v688_v18, %v688_v18  ;;  %v699_v24 = vadd.f32 %v2122_v21, %v2550_v26  ;;  %v1949_v25 = vpack.c.bf16 %v624_v20, %v624_v20  ;;  %v635_v27 = vadd.f32 %v2106_v23, %v2550_v26 }
 0x166   : > { %1225 = vst.msk [vmem:[%s2559_s29 + $0x28] sm:$0xf] %vm1214_vm1, %v1951_v19  ;;  %v690_v28 = vpop.f32.mrf.mxu1  ;;  %v626_v30 = vpop.f32.mrf.mxu0 }
 0x167   : > { %1239 = vst.msk [vmem:[%s2559_s29 + $0x60] sm:$0xf] %vm1214_vm1, %v1965_v22  ;;  %v1968_v29 = vpack.c.bf16 %v699_v24, %v699_v24  ;;  %v691_v31 = vadd.f32 %v2550_v26, %v690_v28  ;;  %1223 = vst.msk [vmem:[%s2559_s29 + $0x20] sm:$0xf] %vm1214_vm1, %v1949_v25  ;;  %v1952_v32 = vpack.c.bf16 %v635_v27, %v635_v27 }
 0x168   : > { %v627_v33 = vadd.f32 %v2550_v26, %v626_v30  ;;  %v2125_v34 = vpop.f32.mrf.mxu1  ;;  %v2109_v36 = vpop.f32.mrf.mxu0 }
 0x169   : > { %1242 = vst.msk [vmem:[%s2559_s29 + $0x6c] sm:$0xf] %vm1214_vm1, %v1968_v29  ;;  %v1966_v35 = vpack.c.bf16 %v691_v31, %v691_v31  ;;  %v712_v37 = vadd.f32 %v2125_v34, %v2550_v26  ;;  %1226 = vst.msk [vmem:[%s2559_s29 + $0x2c] sm:$0xf] %vm1214_vm1, %v1952_v32  ;;  %v648_v39 = vadd.f32 %v2109_v36, %v2550_v26 }
 0x16a   : > { %v1950_v38 = vpack.c.bf16 %v627_v33, %v627_v33  ;;  %v703_v40 = vpop.f32.mrf.mxu1  ;;  %v639_v42 = vpop.f32.mrf.mxu0 }
 0x16b   : > { %1240 = vst.msk [vmem:[%s2559_s29 + $0x64] sm:$0xf] %vm1214_vm1, %v1966_v35  ;;  %v1971_v41 = vpack.c.bf16 %v712_v37, %v712_v37  ;;  %v704_v43 = vadd.f32 %v2550_v26, %v703_v40  ;;  %v1955_v44 = vpack.c.bf16 %v648_v39, %v648_v39  ;;  %v640_v45 = vadd.f32 %v2550_v26, %v639_v42 }
 0x16c   : > { %1224 = vst.msk [vmem:[%s2559_s29 + $0x24] sm:$0xf] %vm1214_vm1, %v1950_v38  ;;  %v2126_v46 = vpop.f32.mrf.mxu1  ;;  %v2110_v48 = vpop.f32.mrf.mxu0 }
 0x16d   : > { %1245 = vst.msk [vmem:[%s2559_s29 + $0x78] sm:$0xf] %vm1214_vm1, %v1971_v41  ;;  %v1969_v47 = vpack.c.bf16 %v704_v43, %v704_v43  ;;  %v715_v49 = vadd.f32 %v2126_v46, %v2550_v26  ;;  %1229 = vst.msk [vmem:[%s2559_s29 + $0x38] sm:$0xf] %vm1214_vm1, %v1955_v44  ;;  %v1953_v50 = vpack.c.bf16 %v640_v45, %v640_v45 }
 0x16e   : > { %v651_v51 = vadd.f32 %v2110_v48, %v2550_v26  ;;  %v706_v52 = vpop.f32.mrf.mxu1  ;;  %v642_v55 = vpop.f32.mrf.mxu0 }
 0x16f   : > { %1243 = vst.msk [vmem:[%s2559_s29 + $0x70] sm:$0xf] %vm1214_vm1, %v1969_v47  ;;  %v1972_v54 = vpack.c.bf16 %v715_v49, %v715_v49  ;;  %v707_v56 = vadd.f32 %v2550_v26, %v706_v52  ;;  %1227 = vst.msk [vmem:[%s2559_s29 + $0x30] sm:$0xf] %vm1214_vm1, %v1953_v50  ;;  %v643_v59 = vadd.f32 %v2550_v26, %v642_v55 }
 0x170   : > { %v1956_v58 = vpack.c.bf16 %v651_v51, %v651_v51  ;;  %v2133_v60 = vpop.f32.mrf.mxu1  ;;  %v2169_v63 = vpop.f32.mrf.mxu0 }
 0x171   : > { %1246 = vst.msk [vmem:[%s2559_s29 + $0x7c] sm:$0xf] %vm1214_vm1, %v1972_v54  ;;  %v1970_v61 = vpack.c.bf16 %v707_v56, %v707_v56  ;;  %v784_v62 = vadd.f32 %v2133_v60, %v2645_v53  ;;  %v1954_v0 = vpack.c.bf16 %v643_v59, %v643_v59  ;;  %v968_v1 = vadd.f32 %v2169_v63, %v2653_v57 }
 0x172   : > { %1230 = vst.msk [vmem:[%s2559_s29 + $0x3c] sm:$0xf] %vm1214_vm1, %v1956_v58  ;;  %v775_v26 = vpop.f32.mrf.mxu1  ;;  %v959_v4 = vpop.f32.mrf.mxu0 }
 0x173   : > { %1244 = vst.msk [vmem:[%s2559_s29 + $0x74] sm:$0xf] %vm1214_vm1, %v1970_v61  ;;  %v1975_v2 = vpack.c.bf16 %v784_v62, %v784_v62  ;;  %v776_v3 = vadd.f32 %v2645_v53, %v775_v26  ;;  %1228 = vst.msk [vmem:[%s2559_s29 + $0x34] sm:$0xf] %vm1214_vm1, %v1954_v0  ;;  %v2007_v5 = vpack.c.bf16 %v968_v1, %v968_v1 }
 0x174   : > { %v960_v6 = vadd.f32 %v2653_v57, %v959_v4  ;;  %v2134_v7 = vpop.f32.mrf.mxu1  ;;  %v2170_v10 = vpop.f32.mrf.mxu0 }
 0x175   : > { %1377 = vst.msk [vmem:[%s2667_s23 + $0x8] sm:$0xf] %vm1214_vm1, %v1975_v2  ;;  %v1973_v8 = vpack.c.bf16 %v776_v3, %v776_v3  ;;  %v787_v9 = vadd.f32 %v2134_v7, %v2645_v53  ;;  %v971_v12 = vadd.f32 %v2170_v10, %v2653_v57 }
 0x176   : > { %1538 = vst.msk [vmem:[%s2676_s24 + $0x8] sm:$0xf] %vm1535_vm2, %v2007_v5  ;;  %v2005_v11 = vpack.c.bf16 %v960_v6, %v960_v6  ;;  %v778_v13 = vpop.f32.mrf.mxu1  ;;  %v962_v16 = vpop.f32.mrf.mxu0 }
 0x177   : > { %1375 = vst.msk [vmem:[%s2667_s23] sm:$0xf] %vm1214_vm1, %v1973_v8  ;;  %v1976_v14 = vpack.c.bf16 %v787_v9, %v787_v9  ;;  %v779_v15 = vadd.f32 %v2645_v53, %v778_v13  ;;  %v2008_v17 = vpack.c.bf16 %v971_v12, %v971_v12  ;;  %v963_v18 = vadd.f32 %v2653_v57, %v962_v16 }
 0x178   : > { %1536 = vst.msk [vmem:[%s2676_s24] sm:$0xf] %vm1535_vm2, %v2005_v11  ;;  %v2137_v19 = vpop.f32.mrf.mxu1  ;;  %v2173_v22 = vpop.f32.mrf.mxu0 }
 0x179   : > { %1378 = vst.msk [vmem:[%s2667_s23 + $0xc] sm:$0xf] %vm1214_vm1, %v1976_v14  ;;  %v1974_v20 = vpack.c.bf16 %v779_v15, %v779_v15  ;;  %v800_v21 = vadd.f32 %v2137_v19, %v2645_v53  ;;  %v2006_v23 = vpack.c.bf16 %v963_v18, %v963_v18  ;;  %v984_v24 = vadd.f32 %v2173_v22, %v2653_v57 }
 0x17a   : > { %1539 = vst.msk [vmem:[%s2676_s24 + $0xc] sm:$0xf] %vm1535_vm2, %v2008_v17  ;;  %v791_v25 = vpop.f32.mrf.mxu1  ;;  %v975_v29 = vpop.f32.mrf.mxu0 }
 0x17b   : > { %1376 = vst.msk [vmem:[%s2667_s23 + $0x4] sm:$0xf] %vm1214_vm1, %v1974_v20  ;;  %v1979_v27 = vpack.c.bf16 %v800_v21, %v800_v21  ;;  %v792_v28 = vadd.f32 %v2645_v53, %v791_v25  ;;  %v2011_v30 = vpack.c.bf16 %v984_v24, %v984_v24  ;;  %v976_v31 = vadd.f32 %v2653_v57, %v975_v29 }
 0x17c   : > { %1537 = vst.msk [vmem:[%s2676_s24 + $0x4] sm:$0xf] %vm1535_vm2, %v2006_v23  ;;  %v2138_v32 = vpop.f32.mrf.mxu1  ;;  %v2174_v35 = vpop.f32.mrf.mxu0 }
 0x17d   : > { %1381 = vst.msk [vmem:[%s2667_s23 + $0x18] sm:$0xf] %vm1214_vm1, %v1979_v27  ;;  %v1977_v33 = vpack.c.bf16 %v792_v28, %v792_v28  ;;  %v803_v34 = vadd.f32 %v2138_v32, %v2645_v53  ;;  %v2009_v36 = vpack.c.bf16 %v976_v31, %v976_v31  ;;  %v987_v37 = vadd.f32 %v2174_v35, %v2653_v57 }
 0x17e   : > { %1542 = vst.msk [vmem:[%s2676_s24 + $0x18] sm:$0xf] %vm1535_vm2, %v2011_v30  ;;  %v794_v38 = vpop.f32.mrf.mxu1  ;;  %v978_v41 = vpop.f32.mrf.mxu0 }
 0x17f   : > { %1379 = vst.msk [vmem:[%s2667_s23 + $0x10] sm:$0xf] %vm1214_vm1, %v1977_v33  ;;  %v1980_v39 = vpack.c.bf16 %v803_v34, %v803_v34  ;;  %v795_v40 = vadd.f32 %v2645_v53, %v794_v38  ;;  %v2012_v42 = vpack.c.bf16 %v987_v37, %v987_v37  ;;  %v979_v43 = vadd.f32 %v2653_v57, %v978_v41 }
 0x180   : > { %1540 = vst.msk [vmem:[%s2676_s24 + $0x10] sm:$0xf] %vm1535_vm2, %v2009_v36  ;;  %v2141_v44 = vpop.f32.mrf.mxu1  ;;  %v2177_v47 = vpop.f32.mrf.mxu0 }
 0x181   : > { %1382 = vst.msk [vmem:[%s2667_s23 + $0x1c] sm:$0xf] %vm1214_vm1, %v1980_v39  ;;  %v1978_v45 = vpack.c.bf16 %v795_v40, %v795_v40  ;;  %v816_v46 = vadd.f32 %v2141_v44, %v2645_v53  ;;  %v2010_v48 = vpack.c.bf16 %v979_v43, %v979_v43  ;;  %v1000_v49 = vadd.f32 %v2177_v47, %v2653_v57 }
 0x182   : > { %1543 = vst.msk [vmem:[%s2676_s24 + $0x1c] sm:$0xf] %vm1535_vm2, %v2012_v42  ;;  %v807_v50 = vpop.f32.mrf.mxu1  ;;  %v991_v54 = vpop.f32.mrf.mxu0 }
 0x183   : > { %1380 = vst.msk [vmem:[%s2667_s23 + $0x14] sm:$0xf] %vm1214_vm1, %v1978_v45  ;;  %v1983_v51 = vpack.c.bf16 %v816_v46, %v816_v46  ;;  %v808_v52 = vadd.f32 %v2645_v53, %v807_v50  ;;  %v2015_v55 = vpack.c.bf16 %v1000_v49, %v1000_v49  ;;  %v992_v56 = vadd.f32 %v2653_v57, %v991_v54 }
 0x184   : > { %1541 = vst.msk [vmem:[%s2676_s24 + $0x14] sm:$0xf] %vm1535_vm2, %v2010_v48  ;;  %v2142_v58 = vpop.f32.mrf.mxu1  ;;  %v2178_v61 = vpop.f32.mrf.mxu0 }
 0x185   : > { %1385 = vst.msk [vmem:[%s2667_s23 + $0x28] sm:$0xf] %vm1214_vm1, %v1983_v51  ;;  %v1981_v59 = vpack.c.bf16 %v808_v52, %v808_v52  ;;  %v819_v60 = vadd.f32 %v2142_v58, %v2645_v53  ;;  %v2013_v62 = vpack.c.bf16 %v992_v56, %v992_v56  ;;  %v1003_v63 = vadd.f32 %v2178_v61, %v2653_v57 }
 0x186   : > { %1546 = vst.msk [vmem:[%s2676_s24 + $0x28] sm:$0xf] %vm1535_vm2, %v2015_v55  ;;  %v810_v0 = vpop.f32.mrf.mxu1  ;;  %v994_v2 = vpop.f32.mrf.mxu0 }
 0x187   : > { %1383 = vst.msk [vmem:[%s2667_s23 + $0x20] sm:$0xf] %vm1214_vm1, %v1981_v59  ;;  %v1984_v1 = vpack.c.bf16 %v819_v60, %v819_v60  ;;  %v811_v26 = vadd.f32 %v2645_v53, %v810_v0  ;;  %v2016_v3 = vpack.c.bf16 %v1003_v63, %v1003_v63  ;;  %v995_v4 = vadd.f32 %v2653_v57, %v994_v2 }
 0x188   : > { %1544 = vst.msk [vmem:[%s2676_s24 + $0x20] sm:$0xf] %vm1535_vm2, %v2013_v62  ;;  %v2145_v5 = vpop.f32.mrf.mxu1  ;;  %v2181_v8 = vpop.f32.mrf.mxu0 }
 0x189   : > { %1386 = vst.msk [vmem:[%s2667_s23 + $0x2c] sm:$0xf] %vm1214_vm1, %v1984_v1  ;;  %v1982_v6 = vpack.c.bf16 %v811_v26, %v811_v26  ;;  %v832_v7 = vadd.f32 %v2145_v5, %v2645_v53  ;;  %v2014_v9 = vpack.c.bf16 %v995_v4, %v995_v4  ;;  %v1016_v10 = vadd.f32 %v2181_v8, %v2653_v57 }
 0x18a   : > { %1547 = vst.msk [vmem:[%s2676_s24 + $0x2c] sm:$0xf] %vm1535_vm2, %v2016_v3  ;;  %v823_v11 = vpop.f32.mrf.mxu1  ;;  %v1007_v14 = vpop.f32.mrf.mxu0 }
 0x18b   : > { %1384 = vst.msk [vmem:[%s2667_s23 + $0x24] sm:$0xf] %vm1214_vm1, %v1982_v6  ;;  %v1987_v12 = vpack.c.bf16 %v832_v7, %v832_v7  ;;  %v824_v13 = vadd.f32 %v2645_v53, %v823_v11  ;;  %v2019_v15 = vpack.c.bf16 %v1016_v10, %v1016_v10  ;;  %v1008_v16 = vadd.f32 %v2653_v57, %v1007_v14 }
 0x18c   : > { %1545 = vst.msk [vmem:[%s2676_s24 + $0x24] sm:$0xf] %vm1535_vm2, %v2014_v9  ;;  %v2146_v17 = vpop.f32.mrf.mxu1  ;;  %v2182_v20 = vpop.f32.mrf.mxu0 }
 0x18d   : > { %1389 = vst.msk [vmem:[%s2667_s23 + $0x38] sm:$0xf] %vm1214_vm1, %v1987_v12  ;;  %v1985_v18 = vpack.c.bf16 %v824_v13, %v824_v13  ;;  %v835_v19 = vadd.f32 %v2146_v17, %v2645_v53  ;;  %v2017_v21 = vpack.c.bf16 %v1008_v16, %v1008_v16  ;;  %v1019_v22 = vadd.f32 %v2182_v20, %v2653_v57 }
 0x18e   : > { %1550 = vst.msk [vmem:[%s2676_s24 + $0x38] sm:$0xf] %vm1535_vm2, %v2019_v15  ;;  %v826_v23 = vpop.f32.mrf.mxu1  ;;  %v1010_v27 = vpop.f32.mrf.mxu0 }
 0x18f   : > { %1387 = vst.msk [vmem:[%s2667_s23 + $0x30] sm:$0xf] %vm1214_vm1, %v1985_v18  ;;  %v1988_v24 = vpack.c.bf16 %v835_v19, %v835_v19  ;;  %v827_v25 = vadd.f32 %v2645_v53, %v826_v23  ;;  %v2020_v28 = vpack.c.bf16 %v1019_v22, %v1019_v22  ;;  %v1011_v29 = vadd.f32 %v2653_v57, %v1010_v27 }
 0x190   : > { %1548 = vst.msk [vmem:[%s2676_s24 + $0x30] sm:$0xf] %vm1535_vm2, %v2017_v21  ;;  %v2149_v30 = vpop.f32.mrf.mxu1  ;;  %v2185_v33 = vpop.f32.mrf.mxu0 }
 0x191   : > { %1390 = vst.msk [vmem:[%s2667_s23 + $0x3c] sm:$0xf] %vm1214_vm1, %v1988_v24  ;;  %v1986_v31 = vpack.c.bf16 %v827_v25, %v827_v25  ;;  %v848_v32 = vadd.f32 %v2149_v30, %v2645_v53  ;;  %v2018_v34 = vpack.c.bf16 %v1011_v29, %v1011_v29  ;;  %v1032_v35 = vadd.f32 %v2185_v33, %v2653_v57 }
 0x192   : > { %1551 = vst.msk [vmem:[%s2676_s24 + $0x3c] sm:$0xf] %vm1535_vm2, %v2020_v28  ;;  %v839_v36 = vpop.f32.mrf.mxu1  ;;  %v1023_v39 = vpop.f32.mrf.mxu0 }
 0x193   : > { %1388 = vst.msk [vmem:[%s2667_s23 + $0x34] sm:$0xf] %vm1214_vm1, %v1986_v31  ;;  %v1991_v37 = vpack.c.bf16 %v848_v32, %v848_v32  ;;  %v840_v38 = vadd.f32 %v2645_v53, %v839_v36  ;;  %v2023_v40 = vpack.c.bf16 %v1032_v35, %v1032_v35  ;;  %v1024_v41 = vadd.f32 %v2653_v57, %v1023_v39 }
 0x194   : > { %1549 = vst.msk [vmem:[%s2676_s24 + $0x34] sm:$0xf] %vm1535_vm2, %v2018_v34  ;;  %v2150_v42 = vpop.f32.mrf.mxu1  ;;  %v2186_v45 = vpop.f32.mrf.mxu0 }
 0x195   : > { %1393 = vst.msk [vmem:[%s2667_s23 + $0x48] sm:$0xf] %vm1214_vm1, %v1991_v37  ;;  %v1989_v43 = vpack.c.bf16 %v840_v38, %v840_v38  ;;  %v851_v44 = vadd.f32 %v2150_v42, %v2645_v53  ;;  %v2021_v46 = vpack.c.bf16 %v1024_v41, %v1024_v41  ;;  %v1035_v47 = vadd.f32 %v2186_v45, %v2653_v57 }
 0x196   : > { %1554 = vst.msk [vmem:[%s2676_s24 + $0x48] sm:$0xf] %vm1535_vm2, %v2023_v40  ;;  %v842_v48 = vpop.f32.mrf.mxu1  ;;  %v1026_v51 = vpop.f32.mrf.mxu0 }
 0x197   : > { %1391 = vst.msk [vmem:[%s2667_s23 + $0x40] sm:$0xf] %vm1214_vm1, %v1989_v43  ;;  %v1992_v49 = vpack.c.bf16 %v851_v44, %v851_v44  ;;  %v843_v50 = vadd.f32 %v2645_v53, %v842_v48  ;;  %v2024_v52 = vpack.c.bf16 %v1035_v47, %v1035_v47  ;;  %v1027_v54 = vadd.f32 %v2653_v57, %v1026_v51 }
 0x198   : > { %1552 = vst.msk [vmem:[%s2676_s24 + $0x40] sm:$0xf] %vm1535_vm2, %v2021_v46  ;;  %v2153_v55 = vpop.f32.mrf.mxu1  ;;  %v2189_v59 = vpop.f32.mrf.mxu0 }
 0x199   : > { %1394 = vst.msk [vmem:[%s2667_s23 + $0x4c] sm:$0xf] %vm1214_vm1, %v1992_v49  ;;  %v1990_v56 = vpack.c.bf16 %v843_v50, %v843_v50  ;;  %v864_v58 = vadd.f32 %v2153_v55, %v2645_v53  ;;  %v2022_v60 = vpack.c.bf16 %v1027_v54, %v1027_v54  ;;  %v1048_v61 = vadd.f32 %v2189_v59, %v2653_v57 }
 0x19a   : > { %1555 = vst.msk [vmem:[%s2676_s24 + $0x4c] sm:$0xf] %vm1535_vm2, %v2024_v52  ;;  %v855_v62 = vpop.f32.mrf.mxu1  ;;  %v1039_v1 = vpop.f32.mrf.mxu0 }
 0x19b   : > { %1392 = vst.msk [vmem:[%s2667_s23 + $0x44] sm:$0xf] %vm1214_vm1, %v1990_v56  ;;  %v1995_v63 = vpack.c.bf16 %v864_v58, %v864_v58  ;;  %v856_v0 = vadd.f32 %v2645_v53, %v855_v62  ;;  %v2027_v26 = vpack.c.bf16 %v1048_v61, %v1048_v61  ;;  %v1040_v2 = vadd.f32 %v2653_v57, %v1039_v1 }
 0x19c   : > { %1553 = vst.msk [vmem:[%s2676_s24 + $0x44] sm:$0xf] %vm1535_vm2, %v2022_v60  ;;  %v2154_v3 = vpop.f32.mrf.mxu1  ;;  %v2190_v6 = vpop.f32.mrf.mxu0 }
 0x19d   : > { %1397 = vst.msk [vmem:[%s2667_s23 + $0x58] sm:$0xf] %vm1214_vm1, %v1995_v63  ;;  %v1993_v4 = vpack.c.bf16 %v856_v0, %v856_v0  ;;  %v867_v5 = vadd.f32 %v2154_v3, %v2645_v53  ;;  %v2025_v7 = vpack.c.bf16 %v1040_v2, %v1040_v2  ;;  %v1051_v8 = vadd.f32 %v2190_v6, %v2653_v57 }
 0x19e   : > { %1558 = vst.msk [vmem:[%s2676_s24 + $0x58] sm:$0xf] %vm1535_vm2, %v2027_v26  ;;  %v858_v9 = vpop.f32.mrf.mxu1  ;;  %v1042_v12 = vpop.f32.mrf.mxu0 }
 0x19f   : > { %1395 = vst.msk [vmem:[%s2667_s23 + $0x50] sm:$0xf] %vm1214_vm1, %v1993_v4  ;;  %v1996_v10 = vpack.c.bf16 %v867_v5, %v867_v5  ;;  %v859_v11 = vadd.f32 %v2645_v53, %v858_v9  ;;  %v2028_v13 = vpack.c.bf16 %v1051_v8, %v1051_v8  ;;  %v1043_v14 = vadd.f32 %v2653_v57, %v1042_v12 }
 0x1a0   : > { %1556 = vst.msk [vmem:[%s2676_s24 + $0x50] sm:$0xf] %vm1535_vm2, %v2025_v7  ;;  %v2157_v15 = vpop.f32.mrf.mxu1  ;;  %v2193_v18 = vpop.f32.mrf.mxu0 }
 0x1a1   : > { %1398 = vst.msk [vmem:[%s2667_s23 + $0x5c] sm:$0xf] %vm1214_vm1, %v1996_v10  ;;  %v1994_v16 = vpack.c.bf16 %v859_v11, %v859_v11  ;;  %v880_v17 = vadd.f32 %v2157_v15, %v2645_v53  ;;  %v2026_v19 = vpack.c.bf16 %v1043_v14, %v1043_v14  ;;  %v1064_v20 = vadd.f32 %v2193_v18, %v2653_v57 }
 0x1a2   : > { %1559 = vst.msk [vmem:[%s2676_s24 + $0x5c] sm:$0xf] %vm1535_vm2, %v2028_v13  ;;  %v871_v21 = vpop.f32.mrf.mxu1  ;;  %v1055_v24 = vpop.f32.mrf.mxu0 }
 0x1a3   : > { %1396 = vst.msk [vmem:[%s2667_s23 + $0x54] sm:$0xf] %vm1214_vm1, %v1994_v16  ;;  %v1999_v22 = vpack.c.bf16 %v880_v17, %v880_v17  ;;  %v872_v23 = vadd.f32 %v2645_v53, %v871_v21  ;;  %v2031_v25 = vpack.c.bf16 %v1064_v20, %v1064_v20  ;;  %v1056_v27 = vadd.f32 %v2653_v57, %v1055_v24 }
 0x1a4   : > { %1557 = vst.msk [vmem:[%s2676_s24 + $0x54] sm:$0xf] %vm1535_vm2, %v2026_v19  ;;  %v2158_v28 = vpop.f32.mrf.mxu1  ;;  %v2194_v31 = vpop.f32.mrf.mxu0 }
 0x1a5   : > { %1401 = vst.msk [vmem:[%s2667_s23 + $0x68] sm:$0xf] %vm1214_vm1, %v1999_v22  ;;  %v1997_v29 = vpack.c.bf16 %v872_v23, %v872_v23  ;;  %v883_v30 = vadd.f32 %v2158_v28, %v2645_v53  ;;  %v2029_v32 = vpack.c.bf16 %v1056_v27, %v1056_v27  ;;  %v1067_v33 = vadd.f32 %v2194_v31, %v2653_v57 }
 0x1a6   : > { %1562 = vst.msk [vmem:[%s2676_s24 + $0x68] sm:$0xf] %vm1535_vm2, %v2031_v25  ;;  %v874_v34 = vpop.f32.mrf.mxu1  ;;  %v1058_v37 = vpop.f32.mrf.mxu0 }
 0x1a7   : > { %1399 = vst.msk [vmem:[%s2667_s23 + $0x60] sm:$0xf] %vm1214_vm1, %v1997_v29  ;;  %v2000_v35 = vpack.c.bf16 %v883_v30, %v883_v30  ;;  %v875_v36 = vadd.f32 %v2645_v53, %v874_v34  ;;  %v2032_v38 = vpack.c.bf16 %v1067_v33, %v1067_v33  ;;  %v1059_v39 = vadd.f32 %v2653_v57, %v1058_v37 }
 0x1a8   : > { %1560 = vst.msk [vmem:[%s2676_s24 + $0x60] sm:$0xf] %vm1535_vm2, %v2029_v32  ;;  %v2161_v40 = vpop.f32.mrf.mxu1  ;;  %v2197_v43 = vpop.f32.mrf.mxu0 }
 0x1a9   : > { %1402 = vst.msk [vmem:[%s2667_s23 + $0x6c] sm:$0xf] %vm1214_vm1, %v2000_v35  ;;  %v1998_v41 = vpack.c.bf16 %v875_v36, %v875_v36  ;;  %v896_v42 = vadd.f32 %v2161_v40, %v2645_v53  ;;  %v2030_v44 = vpack.c.bf16 %v1059_v39, %v1059_v39  ;;  %v1080_v45 = vadd.f32 %v2197_v43, %v2653_v57 }
 0x1aa   : > { %1563 = vst.msk [vmem:[%s2676_s24 + $0x6c] sm:$0xf] %vm1535_vm2, %v2032_v38  ;;  %v887_v46 = vpop.f32.mrf.mxu1  ;;  %v1071_v49 = vpop.f32.mrf.mxu0 }
 0x1ab   : > { %1400 = vst.msk [vmem:[%s2667_s23 + $0x64] sm:$0xf] %vm1214_vm1, %v1998_v41  ;;  %v2003_v47 = vpack.c.bf16 %v896_v42, %v896_v42  ;;  %v888_v48 = vadd.f32 %v2645_v53, %v887_v46  ;;  %v2035_v50 = vpack.c.bf16 %v1080_v45, %v1080_v45  ;;  %v1072_v51 = vadd.f32 %v2653_v57, %v1071_v49 }
 0x1ac   : > { %1561 = vst.msk [vmem:[%s2676_s24 + $0x64] sm:$0xf] %vm1535_vm2, %v2030_v44  ;;  %v2162_v52 = vpop.f32.mrf.mxu1  ;;  %v2198_v56 = vpop.f32.mrf.mxu0 }
 0x1ad   : > { %1405 = vst.msk [vmem:[%s2667_s23 + $0x78] sm:$0xf] %vm1214_vm1, %v2003_v47  ;;  %v2001_v54 = vpack.c.bf16 %v888_v48, %v888_v48  ;;  %v899_v55 = vadd.f32 %v2162_v52, %v2645_v53  ;;  %v2033_v58 = vpack.c.bf16 %v1072_v51, %v1072_v51  ;;  %v1083_v59 = vadd.f32 %v2198_v56, %v2653_v57 }
 0x1ae   : > { %1566 = vst.msk [vmem:[%s2676_s24 + $0x78] sm:$0xf] %vm1535_vm2, %v2035_v50  ;;  %v890_v60 = vpop.f32.mrf.mxu1  ;;  %v1074_v63 = vpop.f32.mrf.mxu0 }
 0x1af   : > { %1403 = vst.msk [vmem:[%s2667_s23 + $0x70] sm:$0xf] %vm1214_vm1, %v2001_v54  ;;  %v2004_v61 = vpack.c.bf16 %v899_v55, %v899_v55  ;;  %v891_v62 = vadd.f32 %v2645_v53, %v890_v60  ;;  %v2036_v0 = vpack.c.bf16 %v1083_v59, %v1083_v59  ;;  %v1075_v1 = vadd.f32 %v2653_v57, %v1074_v63 }
 0x1b0   : > { %1564 = vst.msk [vmem:[%s2676_s24 + $0x70] sm:$0xf] %vm1535_vm2, %v2033_v58 }
 0x1b1   : > { %1406 = vst.msk [vmem:[%s2667_s23 + $0x7c] sm:$0xf] %vm1214_vm1, %v2004_v61  ;;  %v2002_v26 = vpack.c.bf16 %v891_v62, %v891_v62  ;;  %v2034_v2 = vpack.c.bf16 %v1075_v1, %v1075_v1 }
 0x1b2   : > { %1567 = vst.msk [vmem:[%s2676_s24 + $0x7c] sm:$0xf] %vm1535_vm2, %v2036_v0 }
 0x1b3   : > { %1404 = vst.msk [vmem:[%s2667_s23 + $0x74] sm:$0xf] %vm1214_vm1, %v2002_v26 }
 0x1b4   : > { %1565 = vst.msk [vmem:[%s2676_s24 + $0x74] sm:$0xf] %vm1535_vm2, %v2034_v2 }
 0x1b5 PF: > { %s23_s14 = sadd.s32 1, %s2351_s14   ;;  %s2903_s25 = sld [smem:[#allocation5_spill]] }
 0x1b6   : > { %p20_p8 = scmp.ge.s32.totalorder %s23_s14, 4   ;;  %s2904_s30 = smov %s2335_s10 }
 0x1b7   : > { %s2905_s10 = smov %s2339_s11  ;;  %s2906_s11 = smov %s2455_s21 }
 0x1b8   : > { %s2907_s12 = smov %s2347_s13  ;;  %22 = sbr.rel (!%p20_p8) target bundleno = 4 (0x4), region = 112 }
 0x1bb   : > { %s2908_s13 = smov %s2903_s25 }
 0x1bd   :  { %1648 = vsyncpa [#allocation3], 1 }
 0x1be   :  { %1650 = vsyncpa [#allocation3 + $0x1], 1 }

</bundles_post_ra>
